<compile_context>
chip_gen: v7x
topology: tpu7x:2x2x1
jax: 0.10.0
libtpu: 0.0.40
codegen_flags: <defaults>
</compile_context>

<pallas_src>
import functools
import math

import jax
import jax.numpy as jnp
from jax.experimental import pallas as pl
from jax.experimental.pallas import tpu as pltpu


def _layer_norm(x, gamma, beta, eps=1e-5):
    mean = jnp.mean(x, axis=-1, keepdims=True)
    var = jnp.mean((x - mean) ** 2, axis=-1, keepdims=True)
    return (x - mean) * jax.lax.rsqrt(var + eps) * gamma + beta


def block_kernel(x_ref,
                 ln1_g_ref, ln1_b_ref,
                 wq_ref, bq_ref, wk_ref, bk_ref, wv_ref, bv_ref,
                 wp_ref, bp_ref,
                 ln2_g_ref, ln2_b_ref,
                 w1_ref, b1_ref, w2_ref, b2_ref,
                 out_ref, *, n_head):
    # x_ref / out_ref: (1, T, C) block for the current batch element.
    T, C = x_ref.shape[1], x_ref.shape[2]
    hd = C // n_head
    f32 = jnp.float32
    bf16 = jnp.bfloat16

    x = x_ref[0].astype(f32)                                   # (T, C) residual stream

    # ---------------- LN1 + multi-head self-attention + residual ----------------
    h = _layer_norm(x, ln1_g_ref[...].astype(f32), ln1_b_ref[...].astype(f32))
    hb = h.astype(bf16)

    q = jnp.dot(hb, wq_ref[...].astype(bf16), preferred_element_type=f32) + bq_ref[...]
    k = jnp.dot(hb, wk_ref[...].astype(bf16), preferred_element_type=f32) + bk_ref[...]
    v = jnp.dot(hb, wv_ref[...].astype(bf16), preferred_element_type=f32) + bv_ref[...]

    scale = 1.0 / math.sqrt(hd)
    y_acc = jnp.zeros((T, C), f32)                             # attn output already projected
    for hh in range(n_head):                                   # static unroll (tiny n_head)
        lo, hi = hh * hd, (hh + 1) * hd
        qh = q[:, lo:hi].astype(bf16)                          # (T, hd)
        kh = k[:, lo:hi].astype(bf16)
        vh = v[:, lo:hi].astype(bf16)
        # scores = q @ k^T (contract last dims; no explicit transpose needed)
        s = jax.lax.dot_general(qh, kh, (((1,), (1,)), ((), ())),
                                preferred_element_type=f32) * scale      # (T, T)
        s = s - jnp.max(s, axis=-1, keepdims=True)
        p = jnp.exp(s)
        p = p * pl.reciprocal(jnp.sum(p, axis=-1, keepdims=True), approx=True)
        # TODO(synk): attn_drop / resid_drop / mlp Dropout are identity (inference semantics).
        yh = jnp.dot(p.astype(bf16), vh, preferred_element_type=f32)     # (T, hd)
        # Accumulate the output projection per head: y @ Wp == sum_h y_h @ Wp[h-rows]
        y_acc = y_acc + jnp.dot(yh.astype(bf16),
                                wp_ref[lo:hi, :].astype(bf16),
                                preferred_element_type=f32)
    x = x + y_acc + bp_ref[...]

    # ---------------- LN2 + MLP (Linear -> ReLU -> Linear) + residual -----------
    h2 = _layer_norm(x, ln2_g_ref[...].astype(f32), ln2_b_ref[...].astype(f32))
    m = jnp.dot(h2.astype(bf16), w1_ref[...].astype(bf16),
                preferred_element_type=f32) + b1_ref[...]                 # (T, block_exp*C)
    m = jnp.maximum(m, 0.0)
    m = jnp.dot(m.astype(bf16), w2_ref[...].astype(bf16),
                preferred_element_type=f32) + b2_ref[...]                 # (T, C)
    x = x + m

    out_ref[0] = x.astype(out_ref.dtype)


def transformer_block(x, params, *, n_head):
    """x: (B, T, C) float32. params: flat tuple (see init_block_params)."""
    B, T, C = x.shape

    def full_spec(a):
        # Whole (small) parameter resident in VMEM; same block every grid step.
        return pl.BlockSpec(a.shape, lambda b: (0, 0))

    in_specs = [pl.BlockSpec((1, T, C), lambda b: (b, 0, 0))] + [full_spec(p) for p in params]

    kernel = functools.partial(block_kernel, n_head=n_head)
    return pl.pallas_call(
        kernel,
        out_shape=jax.ShapeDtypeStruct((B, T, C), jnp.float32),
        grid=(B,),
        in_specs=in_specs,
        out_specs=pl.BlockSpec((1, T, C), lambda b: (b, 0, 0)),
        compiler_params=pltpu.CompilerParams(dimension_semantics=("parallel",)),
    )(x, *params)


def init_block_params(key, n_embd, block_exp):
    """Deterministic params matching the module structure (PyTorch-style uniform
    Linear init, LayerNorm gamma=1/beta=0). Weights stored as (in, out) so the
    kernel computes x @ W + b."""
    ks = jax.random.split(key, 12)

    def linear(kw, kb, fin, fout):
        bound = 1.0 / math.sqrt(fin)
        w = jax.random.uniform(kw, (fin, fout), jnp.float32, -bound, bound)
        b = jax.random.uniform(kb, (1, fout), jnp.float32, -bound, bound)
        return w, b

    wq, bq = linear(ks[0], ks[1], n_embd, n_embd)
    wk, bk = linear(ks[2], ks[3], n_embd, n_embd)
    wv, bv = linear(ks[4], ks[5], n_embd, n_embd)
    wp, bp = linear(ks[6], ks[7], n_embd, n_embd)
    w1, b1 = linear(ks[8], ks[9], n_embd, block_exp * n_embd)
    w2, b2 = linear(ks[10], ks[11], block_exp * n_embd, n_embd)
    ln1_g = jnp.ones((1, n_embd), jnp.float32)
    ln1_b = jnp.zeros((1, n_embd), jnp.float32)
    ln2_g = jnp.ones((1, n_embd), jnp.float32)
    ln2_b = jnp.zeros((1, n_embd), jnp.float32)
    return (ln1_g, ln1_b, wq, bq, wk, bk, wv, bv, wp, bp,
            ln2_g, ln2_b, w1, b1, w2, b2)


if __name__ == "__main__":
    key = jax.random.PRNGKey(0)
    kx, kp = jax.random.split(key)

    B, T, C = 2, 8, 32          # batch=2, seq=8, n_embd=32
    n_head, block_exp = 4, 4    # 4 heads, MLP hidden = 128 (lane-dense)

    x = jax.random.normal(kx, (B, T, C), jnp.float32)
    params = init_block_params(kp, C, block_exp)

    y = transformer_block(x, params, n_head=n_head)
    y = jax.block_until_ready(y)
    assert y.shape == (B, T, C), y.shape
    print("KERNEL_OK")
</pallas_src>

<mosaic_0001>
module attributes {stable_mosaic.version = 11 : i64} {
  func.func @block_kernel(%arg0: i32, %arg1: memref<1x8x32xf32, #tpu.memory_space<vmem>>, %arg2: memref<1x32xf32, #tpu.memory_space<vmem>>, %arg3: memref<1x32xf32, #tpu.memory_space<vmem>>, %arg4: memref<32x32xf32, #tpu.memory_space<vmem>>, %arg5: memref<1x32xf32, #tpu.memory_space<vmem>>, %arg6: memref<32x32xf32, #tpu.memory_space<vmem>>, %arg7: memref<1x32xf32, #tpu.memory_space<vmem>>, %arg8: memref<32x32xf32, #tpu.memory_space<vmem>>, %arg9: memref<1x32xf32, #tpu.memory_space<vmem>>, %arg10: memref<32x32xf32, #tpu.memory_space<vmem>>, %arg11: memref<1x32xf32, #tpu.memory_space<vmem>>, %arg12: memref<1x32xf32, #tpu.memory_space<vmem>>, %arg13: memref<1x32xf32, #tpu.memory_space<vmem>>, %arg14: memref<32x128xf32, #tpu.memory_space<vmem>>, %arg15: memref<1x128xf32, #tpu.memory_space<vmem>>, %arg16: memref<128x32xf32, #tpu.memory_space<vmem>>, %arg17: memref<1x32xf32, #tpu.memory_space<vmem>>, %arg18: memref<1x8x32xf32, #tpu.memory_space<vmem>>) attributes {dimension_semantics = [#tpu.dimension_semantics<parallel>], iteration_bounds = array<i64: 2>, scalar_prefetch = 0 : i64, scratch_operands = 0 : i64, tpu.core_type = #tpu.core_type<tc>, window_params = [{transform_indices = @transform_0, window_bounds = array<i64: 1, 8, 32>}, {pipeline_mode = #tpu.pipeline_mode<synchronous>, transform_indices = @transform_1, window_bounds = array<i64: 1, 32>}, {pipeline_mode = #tpu.pipeline_mode<synchronous>, transform_indices = @transform_2, window_bounds = array<i64: 1, 32>}, {pipeline_mode = #tpu.pipeline_mode<synchronous>, transform_indices = @transform_3, window_bounds = array<i64: 32, 32>}, {pipeline_mode = #tpu.pipeline_mode<synchronous>, transform_indices = @transform_4, window_bounds = array<i64: 1, 32>}, {pipeline_mode = #tpu.pipeline_mode<synchronous>, transform_indices = @transform_5, window_bounds = array<i64: 32, 32>}, {pipeline_mode = #tpu.pipeline_mode<synchronous>, transform_indices = @transform_6, window_bounds = array<i64: 1, 32>}, {pipeline_mode = #tpu.pipeline_mode<synchronous>, transform_indices = @transform_7, window_bounds = array<i64: 32, 32>}, {pipeline_mode = #tpu.pipeline_mode<synchronous>, transform_indices = @transform_8, window_bounds = array<i64: 1, 32>}, {pipeline_mode = #tpu.pipeline_mode<synchronous>, transform_indices = @transform_9, window_bounds = array<i64: 32, 32>}, {pipeline_mode = #tpu.pipeline_mode<synchronous>, transform_indices = @transform_10, window_bounds = array<i64: 1, 32>}, {pipeline_mode = #tpu.pipeline_mode<synchronous>, transform_indices = @transform_11, window_bounds = array<i64: 1, 32>}, {pipeline_mode = #tpu.pipeline_mode<synchronous>, transform_indices = @transform_12, window_bounds = array<i64: 1, 32>}, {pipeline_mode = #tpu.pipeline_mode<synchronous>, transform_indices = @transform_13, window_bounds = array<i64: 32, 128>}, {pipeline_mode = #tpu.pipeline_mode<synchronous>, transform_indices = @transform_14, window_bounds = array<i64: 1, 128>}, {pipeline_mode = #tpu.pipeline_mode<synchronous>, transform_indices = @transform_15, window_bounds = array<i64: 128, 32>}, {pipeline_mode = #tpu.pipeline_mode<synchronous>, transform_indices = @transform_16, window_bounds = array<i64: 1, 32>}, {transform_indices = @transform_17, window_bounds = array<i64: 1, 8, 32>}]} {
    %c0 = arith.constant 0 : index
    %c0_0 = arith.constant 0 : index
    %c0_1 = arith.constant 0 : index
    %0 = vector.load %arg1[%c0, %c0_0, %c0_1] : memref<1x8x32xf32, #tpu.memory_space<vmem>>, vector<1x8x32xf32>
    %1 = vector.shape_cast %0 : vector<1x8x32xf32> to vector<8x32xf32>
    %c0_2 = arith.constant 0 : index
    %c0_3 = arith.constant 0 : index
    %2 = vector.load %arg2[%c0_2, %c0_3] : memref<1x32xf32, #tpu.memory_space<vmem>>, vector<1x32xf32>
    %c0_4 = arith.constant 0 : index
    %c0_5 = arith.constant 0 : index
    %3 = vector.load %arg3[%c0_4, %c0_5] : memref<1x32xf32, #tpu.memory_space<vmem>>, vector<1x32xf32>
    %cst = arith.constant dense<0.000000e+00> : vector<8xf32>
    %4 = vector.multi_reduction <add>, %1, %cst [1] : vector<8x32xf32> to vector<8xf32>
    %5 = vector.shape_cast %4 : vector<8xf32> to vector<8x1xf32>
    %cst_6 = arith.constant 3.200000e+01 : f32
    %6 = vector.broadcast %cst_6 : f32 to vector<8x1xf32>
    %7 = arith.divf %5, %6 : vector<8x1xf32>
    %8 = vector.broadcast %7 : vector<8x1xf32> to vector<8x32xf32>
    %9 = arith.subf %1, %8 : vector<8x32xf32>
    %10 = arith.mulf %9, %9 : vector<8x32xf32>
    %cst_7 = arith.constant dense<0.000000e+00> : vector<8xf32>
    %11 = vector.multi_reduction <add>, %10, %cst_7 [1] : vector<8x32xf32> to vector<8xf32>
    %12 = vector.shape_cast %11 : vector<8xf32> to vector<8x1xf32>
    %cst_8 = arith.constant 3.200000e+01 : f32
    %13 = vector.broadcast %cst_8 : f32 to vector<8x1xf32>
    %14 = arith.divf %12, %13 : vector<8x1xf32>
    %15 = vector.broadcast %7 : vector<8x1xf32> to vector<8x32xf32>
    %16 = arith.subf %1, %15 : vector<8x32xf32>
    %cst_9 = arith.constant 9.99999974E-6 : f32
    %17 = vector.broadcast %cst_9 : f32 to vector<8x1xf32>
    %18 = arith.addf %14, %17 : vector<8x1xf32>
    %19 = math.rsqrt %18 : vector<8x1xf32>
    %20 = vector.broadcast %19 : vector<8x1xf32> to vector<8x32xf32>
    %21 = arith.mulf %16, %20 : vector<8x32xf32>
    %22 = vector.broadcast %2 : vector<1x32xf32> to vector<8x32xf32>
    %23 = arith.mulf %21, %22 : vector<8x32xf32>
    %24 = vector.broadcast %3 : vector<1x32xf32> to vector<8x32xf32>
    %25 = arith.addf %23, %24 : vector<8x32xf32>
    %26 = arith.truncf %25 : vector<8x32xf32> to vector<8x32xbf16>
    %c0_10 = arith.constant 0 : index
    %c0_11 = arith.constant 0 : index
    %27 = vector.load %arg4[%c0_10, %c0_11] : memref<32x32xf32, #tpu.memory_space<vmem>>, vector<32x32xf32>
    %28 = arith.truncf %27 : vector<32x32xf32> to vector<32x32xbf16>
    %cst_12 = arith.constant dense<0.000000e+00> : vector<8x32xf32>
    %29 = tpu.matmul %26, %28, %cst_12 {dimension_numbers = #tpu.dot_dimension_numbers<[1], [0], [0], [1], [0, 0, 1, 1], [], []>} : vector<8x32xbf16>, vector<32x32xbf16>, vector<8x32xf32> -> vector<8x32xf32>
    %c0_13 = arith.constant 0 : index
    %c0_14 = arith.constant 0 : index
    %30 = vector.load %arg5[%c0_13, %c0_14] : memref<1x32xf32, #tpu.memory_space<vmem>>, vector<1x32xf32>
    %31 = vector.broadcast %30 : vector<1x32xf32> to vector<8x32xf32>
    %32 = arith.addf %29, %31 : vector<8x32xf32>
    %c0_15 = arith.constant 0 : index
    %c0_16 = arith.constant 0 : index
    %33 = vector.load %arg6[%c0_15, %c0_16] : memref<32x32xf32, #tpu.memory_space<vmem>>, vector<32x32xf32>
    %34 = arith.truncf %33 : vector<32x32xf32> to vector<32x32xbf16>
    %cst_17 = arith.constant dense<0.000000e+00> : vector<8x32xf32>
    %35 = tpu.matmul %26, %34, %cst_17 {dimension_numbers = #tpu.dot_dimension_numbers<[1], [0], [0], [1], [0, 0, 1, 1], [], []>} : vector<8x32xbf16>, vector<32x32xbf16>, vector<8x32xf32> -> vector<8x32xf32>
    %c0_18 = arith.constant 0 : index
    %c0_19 = arith.constant 0 : index
    %36 = vector.load %arg7[%c0_18, %c0_19] : memref<1x32xf32, #tpu.memory_space<vmem>>, vector<1x32xf32>
    %37 = vector.broadcast %36 : vector<1x32xf32> to vector<8x32xf32>
    %38 = arith.addf %35, %37 : vector<8x32xf32>
    %c0_20 = arith.constant 0 : index
    %c0_21 = arith.constant 0 : index
    %39 = vector.load %arg8[%c0_20, %c0_21] : memref<32x32xf32, #tpu.memory_space<vmem>>, vector<32x32xf32>
    %40 = arith.truncf %39 : vector<32x32xf32> to vector<32x32xbf16>
    %cst_22 = arith.constant dense<0.000000e+00> : vector<8x32xf32>
    %41 = tpu.matmul %26, %40, %cst_22 {dimension_numbers = #tpu.dot_dimension_numbers<[1], [0], [0], [1], [0, 0, 1, 1], [], []>} : vector<8x32xbf16>, vector<32x32xbf16>, vector<8x32xf32> -> vector<8x32xf32>
    %c0_23 = arith.constant 0 : index
    %c0_24 = arith.constant 0 : index
    %42 = vector.load %arg9[%c0_23, %c0_24] : memref<1x32xf32, #tpu.memory_space<vmem>>, vector<1x32xf32>
    %43 = vector.broadcast %42 : vector<1x32xf32> to vector<8x32xf32>
    %44 = arith.addf %41, %43 : vector<8x32xf32>
    %cst_25 = arith.constant 0.000000e+00 : f32
    %45 = vector.broadcast %cst_25 : f32 to vector<8x32xf32>
    %46 = vector.extract_strided_slice %32 {offsets = [0, 0], sizes = [8, 8], strides = [1, 1]} : vector<8x32xf32> to vector<8x8xf32>
    %47 = arith.truncf %46 : vector<8x8xf32> to vector<8x8xbf16>
    %48 = vector.extract_strided_slice %38 {offsets = [0, 0], sizes = [8, 8], strides = [1, 1]} : vector<8x32xf32> to vector<8x8xf32>
    %49 = arith.truncf %48 : vector<8x8xf32> to vector<8x8xbf16>
    %50 = vector.extract_strided_slice %44 {offsets = [0, 0], sizes = [8, 8], strides = [1, 1]} : vector<8x32xf32> to vector<8x8xf32>
    %51 = arith.truncf %50 : vector<8x8xf32> to vector<8x8xbf16>
    %cst_26 = arith.constant dense<0.000000e+00> : vector<8x8xf32>
    %52 = tpu.matmul %47, %49, %cst_26 {dimension_numbers = #tpu.dot_dimension_numbers<[1], [1], [0], [0], [0, 0, 1, 0], [], []>} : vector<8x8xbf16>, vector<8x8xbf16>, vector<8x8xf32> -> vector<8x8xf32>
    %cst_27 = arith.constant 0.353553385 : f32
    %53 = vector.broadcast %cst_27 : f32 to vector<8x8xf32>
    %54 = arith.mulf %52, %53 : vector<8x8xf32>
    %cst_28 = arith.constant dense<0xFF800000> : vector<8xf32>
    %55 = vector.multi_reduction <maximumf>, %54, %cst_28 [1] : vector<8x8xf32> to vector<8xf32>
    %56 = vector.shape_cast %55 : vector<8xf32> to vector<8x1xf32>
    %57 = vector.broadcast %56 : vector<8x1xf32> to vector<8x8xf32>
    %58 = arith.subf %54, %57 : vector<8x8xf32>
    %59 = math.exp %58 : vector<8x8xf32>
    %cst_29 = arith.constant dense<0.000000e+00> : vector<8xf32>
    %60 = vector.multi_reduction <add>, %59, %cst_29 [1] : vector<8x8xf32> to vector<8xf32>
    %61 = vector.shape_cast %60 : vector<8xf32> to vector<8x1xf32>
    %62 = tpu.reciprocal %61 {approx = true} : vector<8x1xf32> -> vector<8x1xf32>
    %63 = vector.broadcast %62 : vector<8x1xf32> to vector<8x8xf32>
    %64 = arith.mulf %59, %63 : vector<8x8xf32>
    %65 = arith.truncf %64 : vector<8x8xf32> to vector<8x8xbf16>
    %cst_30 = arith.constant dense<0.000000e+00> : vector<8x8xf32>
    %66 = tpu.matmul %65, %51, %cst_30 {dimension_numbers = #tpu.dot_dimension_numbers<[1], [0], [0], [1], [0, 0, 1, 1], [], []>} : vector<8x8xbf16>, vector<8x8xbf16>, vector<8x8xf32> -> vector<8x8xf32>
    %67 = arith.truncf %66 : vector<8x8xf32> to vector<8x8xbf16>
    %c0_31 = arith.constant 0 : index
    %c0_32 = arith.constant 0 : index
    %68 = vector.load %arg10[%c0_31, %c0_32] : memref<32x32xf32, #tpu.memory_space<vmem>>, vector<8x32xf32>
    %69 = arith.truncf %68 : vector<8x32xf32> to vector<8x32xbf16>
    %cst_33 = arith.constant dense<0.000000e+00> : vector<8x32xf32>
    %70 = tpu.matmul %67, %69, %cst_33 {dimension_numbers = #tpu.dot_dimension_numbers<[1], [0], [0], [1], [0, 0, 1, 1], [], []>} : vector<8x8xbf16>, vector<8x32xbf16>, vector<8x32xf32> -> vector<8x32xf32>
    %71 = arith.addf %45, %70 : vector<8x32xf32>
    %72 = vector.extract_strided_slice %32 {offsets = [0, 8], sizes = [8, 8], strides = [1, 1]} : vector<8x32xf32> to vector<8x8xf32>
    %73 = arith.truncf %72 : vector<8x8xf32> to vector<8x8xbf16>
    %74 = vector.extract_strided_slice %38 {offsets = [0, 8], sizes = [8, 8], strides = [1, 1]} : vector<8x32xf32> to vector<8x8xf32>
    %75 = arith.truncf %74 : vector<8x8xf32> to vector<8x8xbf16>
    %76 = vector.extract_strided_slice %44 {offsets = [0, 8], sizes = [8, 8], strides = [1, 1]} : vector<8x32xf32> to vector<8x8xf32>
    %77 = arith.truncf %76 : vector<8x8xf32> to vector<8x8xbf16>
    %cst_34 = arith.constant dense<0.000000e+00> : vector<8x8xf32>
    %78 = tpu.matmul %73, %75, %cst_34 {dimension_numbers = #tpu.dot_dimension_numbers<[1], [1], [0], [0], [0, 0, 1, 0], [], []>} : vector<8x8xbf16>, vector<8x8xbf16>, vector<8x8xf32> -> vector<8x8xf32>
    %cst_35 = arith.constant 0.353553385 : f32
    %79 = vector.broadcast %cst_35 : f32 to vector<8x8xf32>
    %80 = arith.mulf %78, %79 : vector<8x8xf32>
    %cst_36 = arith.constant dense<0xFF800000> : vector<8xf32>
    %81 = vector.multi_reduction <maximumf>, %80, %cst_36 [1] : vector<8x8xf32> to vector<8xf32>
    %82 = vector.shape_cast %81 : vector<8xf32> to vector<8x1xf32>
    %83 = vector.broadcast %82 : vector<8x1xf32> to vector<8x8xf32>
    %84 = arith.subf %80, %83 : vector<8x8xf32>
    %85 = math.exp %84 : vector<8x8xf32>
    %cst_37 = arith.constant dense<0.000000e+00> : vector<8xf32>
    %86 = vector.multi_reduction <add>, %85, %cst_37 [1] : vector<8x8xf32> to vector<8xf32>
    %87 = vector.shape_cast %86 : vector<8xf32> to vector<8x1xf32>
    %88 = tpu.reciprocal %87 {approx = true} : vector<8x1xf32> -> vector<8x1xf32>
    %89 = vector.broadcast %88 : vector<8x1xf32> to vector<8x8xf32>
    %90 = arith.mulf %85, %89 : vector<8x8xf32>
    %91 = arith.truncf %90 : vector<8x8xf32> to vector<8x8xbf16>
    %cst_38 = arith.constant dense<0.000000e+00> : vector<8x8xf32>
    %92 = tpu.matmul %91, %77, %cst_38 {dimension_numbers = #tpu.dot_dimension_numbers<[1], [0], [0], [1], [0, 0, 1, 1], [], []>} : vector<8x8xbf16>, vector<8x8xbf16>, vector<8x8xf32> -> vector<8x8xf32>
    %93 = arith.truncf %92 : vector<8x8xf32> to vector<8x8xbf16>
    %c8 = arith.constant 8 : index
    %c0_39 = arith.constant 0 : index
    %94 = vector.load %arg10[%c8, %c0_39] : memref<32x32xf32, #tpu.memory_space<vmem>>, vector<8x32xf32>
    %95 = arith.truncf %94 : vector<8x32xf32> to vector<8x32xbf16>
    %cst_40 = arith.constant dense<0.000000e+00> : vector<8x32xf32>
    %96 = tpu.matmul %93, %95, %cst_40 {dimension_numbers = #tpu.dot_dimension_numbers<[1], [0], [0], [1], [0, 0, 1, 1], [], []>} : vector<8x8xbf16>, vector<8x32xbf16>, vector<8x32xf32> -> vector<8x32xf32>
    %97 = arith.addf %71, %96 : vector<8x32xf32>
    %98 = vector.extract_strided_slice %32 {offsets = [0, 16], sizes = [8, 8], strides = [1, 1]} : vector<8x32xf32> to vector<8x8xf32>
    %99 = arith.truncf %98 : vector<8x8xf32> to vector<8x8xbf16>
    %100 = vector.extract_strided_slice %38 {offsets = [0, 16], sizes = [8, 8], strides = [1, 1]} : vector<8x32xf32> to vector<8x8xf32>
    %101 = arith.truncf %100 : vector<8x8xf32> to vector<8x8xbf16>
    %102 = vector.extract_strided_slice %44 {offsets = [0, 16], sizes = [8, 8], strides = [1, 1]} : vector<8x32xf32> to vector<8x8xf32>
    %103 = arith.truncf %102 : vector<8x8xf32> to vector<8x8xbf16>
    %cst_41 = arith.constant dense<0.000000e+00> : vector<8x8xf32>
    %104 = tpu.matmul %99, %101, %cst_41 {dimension_numbers = #tpu.dot_dimension_numbers<[1], [1], [0], [0], [0, 0, 1, 0], [], []>} : vector<8x8xbf16>, vector<8x8xbf16>, vector<8x8xf32> -> vector<8x8xf32>
    %cst_42 = arith.constant 0.353553385 : f32
    %105 = vector.broadcast %cst_42 : f32 to vector<8x8xf32>
    %106 = arith.mulf %104, %105 : vector<8x8xf32>
    %cst_43 = arith.constant dense<0xFF800000> : vector<8xf32>
    %107 = vector.multi_reduction <maximumf>, %106, %cst_43 [1] : vector<8x8xf32> to vector<8xf32>
    %108 = vector.shape_cast %107 : vector<8xf32> to vector<8x1xf32>
    %109 = vector.broadcast %108 : vector<8x1xf32> to vector<8x8xf32>
    %110 = arith.subf %106, %109 : vector<8x8xf32>
    %111 = math.exp %110 : vector<8x8xf32>
    %cst_44 = arith.constant dense<0.000000e+00> : vector<8xf32>
    %112 = vector.multi_reduction <add>, %111, %cst_44 [1] : vector<8x8xf32> to vector<8xf32>
    %113 = vector.shape_cast %112 : vector<8xf32> to vector<8x1xf32>
    %114 = tpu.reciprocal %113 {approx = true} : vector<8x1xf32> -> vector<8x1xf32>
    %115 = vector.broadcast %114 : vector<8x1xf32> to vector<8x8xf32>
    %116 = arith.mulf %111, %115 : vector<8x8xf32>
    %117 = arith.truncf %116 : vector<8x8xf32> to vector<8x8xbf16>
    %cst_45 = arith.constant dense<0.000000e+00> : vector<8x8xf32>
    %118 = tpu.matmul %117, %103, %cst_45 {dimension_numbers = #tpu.dot_dimension_numbers<[1], [0], [0], [1], [0, 0, 1, 1], [], []>} : vector<8x8xbf16>, vector<8x8xbf16>, vector<8x8xf32> -> vector<8x8xf32>
    %119 = arith.truncf %118 : vector<8x8xf32> to vector<8x8xbf16>
    %c16 = arith.constant 16 : index
    %c0_46 = arith.constant 0 : index
    %120 = vector.load %arg10[%c16, %c0_46] : memref<32x32xf32, #tpu.memory_space<vmem>>, vector<8x32xf32>
    %121 = arith.truncf %120 : vector<8x32xf32> to vector<8x32xbf16>
    %cst_47 = arith.constant dense<0.000000e+00> : vector<8x32xf32>
    %122 = tpu.matmul %119, %121, %cst_47 {dimension_numbers = #tpu.dot_dimension_numbers<[1], [0], [0], [1], [0, 0, 1, 1], [], []>} : vector<8x8xbf16>, vector<8x32xbf16>, vector<8x32xf32> -> vector<8x32xf32>
    %123 = arith.addf %97, %122 : vector<8x32xf32>
    %124 = vector.extract_strided_slice %32 {offsets = [0, 24], sizes = [8, 8], strides = [1, 1]} : vector<8x32xf32> to vector<8x8xf32>
    %125 = arith.truncf %124 : vector<8x8xf32> to vector<8x8xbf16>
    %126 = vector.extract_strided_slice %38 {offsets = [0, 24], sizes = [8, 8], strides = [1, 1]} : vector<8x32xf32> to vector<8x8xf32>
    %127 = arith.truncf %126 : vector<8x8xf32> to vector<8x8xbf16>
    %128 = vector.extract_strided_slice %44 {offsets = [0, 24], sizes = [8, 8], strides = [1, 1]} : vector<8x32xf32> to vector<8x8xf32>
    %129 = arith.truncf %128 : vector<8x8xf32> to vector<8x8xbf16>
    %cst_48 = arith.constant dense<0.000000e+00> : vector<8x8xf32>
    %130 = tpu.matmul %125, %127, %cst_48 {dimension_numbers = #tpu.dot_dimension_numbers<[1], [1], [0], [0], [0, 0, 1, 0], [], []>} : vector<8x8xbf16>, vector<8x8xbf16>, vector<8x8xf32> -> vector<8x8xf32>
    %cst_49 = arith.constant 0.353553385 : f32
    %131 = vector.broadcast %cst_49 : f32 to vector<8x8xf32>
    %132 = arith.mulf %130, %131 : vector<8x8xf32>
    %cst_50 = arith.constant dense<0xFF800000> : vector<8xf32>
    %133 = vector.multi_reduction <maximumf>, %132, %cst_50 [1] : vector<8x8xf32> to vector<8xf32>
    %134 = vector.shape_cast %133 : vector<8xf32> to vector<8x1xf32>
    %135 = vector.broadcast %134 : vector<8x1xf32> to vector<8x8xf32>
    %136 = arith.subf %132, %135 : vector<8x8xf32>
    %137 = math.exp %136 : vector<8x8xf32>
    %cst_51 = arith.constant dense<0.000000e+00> : vector<8xf32>
    %138 = vector.multi_reduction <add>, %137, %cst_51 [1] : vector<8x8xf32> to vector<8xf32>
    %139 = vector.shape_cast %138 : vector<8xf32> to vector<8x1xf32>
    %140 = tpu.reciprocal %139 {approx = true} : vector<8x1xf32> -> vector<8x1xf32>
    %141 = vector.broadcast %140 : vector<8x1xf32> to vector<8x8xf32>
    %142 = arith.mulf %137, %141 : vector<8x8xf32>
    %143 = arith.truncf %142 : vector<8x8xf32> to vector<8x8xbf16>
    %cst_52 = arith.constant dense<0.000000e+00> : vector<8x8xf32>
    %144 = tpu.matmul %143, %129, %cst_52 {dimension_numbers = #tpu.dot_dimension_numbers<[1], [0], [0], [1], [0, 0, 1, 1], [], []>} : vector<8x8xbf16>, vector<8x8xbf16>, vector<8x8xf32> -> vector<8x8xf32>
    %145 = arith.truncf %144 : vector<8x8xf32> to vector<8x8xbf16>
    %c24 = arith.constant 24 : index
    %c0_53 = arith.constant 0 : index
    %146 = vector.load %arg10[%c24, %c0_53] : memref<32x32xf32, #tpu.memory_space<vmem>>, vector<8x32xf32>
    %147 = arith.truncf %146 : vector<8x32xf32> to vector<8x32xbf16>
    %cst_54 = arith.constant dense<0.000000e+00> : vector<8x32xf32>
    %148 = tpu.matmul %145, %147, %cst_54 {dimension_numbers = #tpu.dot_dimension_numbers<[1], [0], [0], [1], [0, 0, 1, 1], [], []>} : vector<8x8xbf16>, vector<8x32xbf16>, vector<8x32xf32> -> vector<8x32xf32>
    %149 = arith.addf %123, %148 : vector<8x32xf32>
    %150 = arith.addf %1, %149 : vector<8x32xf32>
    %c0_55 = arith.constant 0 : index
    %c0_56 = arith.constant 0 : index
    %151 = vector.load %arg11[%c0_55, %c0_56] : memref<1x32xf32, #tpu.memory_space<vmem>>, vector<1x32xf32>
    %152 = vector.broadcast %151 : vector<1x32xf32> to vector<8x32xf32>
    %153 = arith.addf %150, %152 : vector<8x32xf32>
    %c0_57 = arith.constant 0 : index
    %c0_58 = arith.constant 0 : index
    %154 = vector.load %arg12[%c0_57, %c0_58] : memref<1x32xf32, #tpu.memory_space<vmem>>, vector<1x32xf32>
    %c0_59 = arith.constant 0 : index
    %c0_60 = arith.constant 0 : index
    %155 = vector.load %arg13[%c0_59, %c0_60] : memref<1x32xf32, #tpu.memory_space<vmem>>, vector<1x32xf32>
    %cst_61 = arith.constant dense<0.000000e+00> : vector<8xf32>
    %156 = vector.multi_reduction <add>, %153, %cst_61 [1] : vector<8x32xf32> to vector<8xf32>
    %157 = vector.shape_cast %156 : vector<8xf32> to vector<8x1xf32>
    %cst_62 = arith.constant 3.200000e+01 : f32
    %158 = vector.broadcast %cst_62 : f32 to vector<8x1xf32>
    %159 = arith.divf %157, %158 : vector<8x1xf32>
    %160 = vector.broadcast %159 : vector<8x1xf32> to vector<8x32xf32>
    %161 = arith.subf %153, %160 : vector<8x32xf32>
    %162 = arith.mulf %161, %161 : vector<8x32xf32>
    %cst_63 = arith.constant dense<0.000000e+00> : vector<8xf32>
    %163 = vector.multi_reduction <add>, %162, %cst_63 [1] : vector<8x32xf32> to vector<8xf32>
    %164 = vector.shape_cast %163 : vector<8xf32> to vector<8x1xf32>
    %cst_64 = arith.constant 3.200000e+01 : f32
    %165 = vector.broadcast %cst_64 : f32 to vector<8x1xf32>
    %166 = arith.divf %164, %165 : vector<8x1xf32>
    %167 = vector.broadcast %159 : vector<8x1xf32> to vector<8x32xf32>
    %168 = arith.subf %153, %167 : vector<8x32xf32>
    %cst_65 = arith.constant 9.99999974E-6 : f32
    %169 = vector.broadcast %cst_65 : f32 to vector<8x1xf32>
    %170 = arith.addf %166, %169 : vector<8x1xf32>
    %171 = math.rsqrt %170 : vector<8x1xf32>
    %172 = vector.broadcast %171 : vector<8x1xf32> to vector<8x32xf32>
    %173 = arith.mulf %168, %172 : vector<8x32xf32>
    %174 = vector.broadcast %154 : vector<1x32xf32> to vector<8x32xf32>
    %175 = arith.mulf %173, %174 : vector<8x32xf32>
    %176 = vector.broadcast %155 : vector<1x32xf32> to vector<8x32xf32>
    %177 = arith.addf %175, %176 : vector<8x32xf32>
    %178 = arith.truncf %177 : vector<8x32xf32> to vector<8x32xbf16>
    %c0_66 = arith.constant 0 : index
    %c0_67 = arith.constant 0 : index
    %179 = vector.load %arg14[%c0_66, %c0_67] : memref<32x128xf32, #tpu.memory_space<vmem>>, vector<32x128xf32>
    %180 = arith.truncf %179 : vector<32x128xf32> to vector<32x128xbf16>
    %cst_68 = arith.constant dense<0.000000e+00> : vector<8x128xf32>
    %181 = tpu.matmul %178, %180, %cst_68 {dimension_numbers = #tpu.dot_dimension_numbers<[1], [0], [0], [1], [0, 0, 1, 1], [], []>} : vector<8x32xbf16>, vector<32x128xbf16>, vector<8x128xf32> -> vector<8x128xf32>
    %c0_69 = arith.constant 0 : index
    %c0_70 = arith.constant 0 : index
    %182 = vector.load %arg15[%c0_69, %c0_70] : memref<1x128xf32, #tpu.memory_space<vmem>>, vector<1x128xf32>
    %183 = vector.broadcast %182 : vector<1x128xf32> to vector<8x128xf32>
    %184 = arith.addf %181, %183 : vector<8x128xf32>
    %cst_71 = arith.constant 0.000000e+00 : f32
    %185 = vector.broadcast %cst_71 : f32 to vector<8x128xf32>
    %186 = arith.maximumf %184, %185 : vector<8x128xf32>
    %187 = arith.truncf %186 : vector<8x128xf32> to vector<8x128xbf16>
    %c0_72 = arith.constant 0 : index
    %c0_73 = arith.constant 0 : index
    %188 = vector.load %arg16[%c0_72, %c0_73] : memref<128x32xf32, #tpu.memory_space<vmem>>, vector<128x32xf32>
    %189 = arith.truncf %188 : vector<128x32xf32> to vector<128x32xbf16>
    %cst_74 = arith.constant dense<0.000000e+00> : vector<8x32xf32>
    %190 = tpu.matmul %187, %189, %cst_74 {dimension_numbers = #tpu.dot_dimension_numbers<[1], [0], [0], [1], [0, 0, 1, 1], [], []>} : vector<8x128xbf16>, vector<128x32xbf16>, vector<8x32xf32> -> vector<8x32xf32>
    %c0_75 = arith.constant 0 : index
    %c0_76 = arith.constant 0 : index
    %191 = vector.load %arg17[%c0_75, %c0_76] : memref<1x32xf32, #tpu.memory_space<vmem>>, vector<1x32xf32>
    %192 = vector.broadcast %191 : vector<1x32xf32> to vector<8x32xf32>
    %193 = arith.addf %190, %192 : vector<8x32xf32>
    %194 = arith.addf %153, %193 : vector<8x32xf32>
    %c0_77 = arith.constant 0 : index
    %c0_78 = arith.constant 0 : index
    %c0_79 = arith.constant 0 : index
    %195 = vector.load %arg18[%c0_77, %c0_78, %c0_79] : memref<1x8x32xf32, #tpu.memory_space<vmem>>, vector<1x8x32xf32>
    %196 = vector.shape_cast %195 : vector<1x8x32xf32> to vector<8x32xf32>
    %197 = vector.shape_cast %194 : vector<8x32xf32> to vector<1x8x32xf32>
    tpu.vector_store %arg18[%c0_77, %c0_78, %c0_79], %197 {strides = array<i32>} : memref<1x8x32xf32, #tpu.memory_space<vmem>>, vector<1x8x32xf32>,
    return
  }
  func.func @transform_0(%arg0: i32) -> (i32, i32, i32) {
    %c0_i32 = arith.constant 0 : i32
    %c0_i32_0 = arith.constant 0 : i32
    %c0_i32_1 = arith.constant 0 : i32
    return %arg0, %c0_i32, %c0_i32_0 : i32, i32, i32
  }
  func.func @transform_1(%arg0: i32) -> (i32, i32) {
    %c0_i32 = arith.constant 0 : i32
    %c0_i32_0 = arith.constant 0 : i32
    %c0_i32_1 = arith.constant 0 : i32
    return %c0_i32, %c0_i32_0 : i32, i32
  }
  func.func @transform_2(%arg0: i32) -> (i32, i32) {
    %c0_i32 = arith.constant 0 : i32
    %c0_i32_0 = arith.constant 0 : i32
    %c0_i32_1 = arith.constant 0 : i32
    return %c0_i32, %c0_i32_0 : i32, i32
  }
  func.func @transform_3(%arg0: i32) -> (i32, i32) {
    %c0_i32 = arith.constant 0 : i32
    %c0_i32_0 = arith.constant 0 : i32
    %c0_i32_1 = arith.constant 0 : i32
    return %c0_i32, %c0_i32_0 : i32, i32
  }
  func.func @transform_4(%arg0: i32) -> (i32, i32) {
    %c0_i32 = arith.constant 0 : i32
    %c0_i32_0 = arith.constant 0 : i32
    %c0_i32_1 = arith.constant 0 : i32
    return %c0_i32, %c0_i32_0 : i32, i32
  }
  func.func @transform_5(%arg0: i32) -> (i32, i32) {
    %c0_i32 = arith.constant 0 : i32
    %c0_i32_0 = arith.constant 0 : i32
    %c0_i32_1 = arith.constant 0 : i32
    return %c0_i32, %c0_i32_0 : i32, i32
  }
  func.func @transform_6(%arg0: i32) -> (i32, i32) {
    %c0_i32 = arith.constant 0 : i32
    %c0_i32_0 = arith.constant 0 : i32
    %c0_i32_1 = arith.constant 0 : i32
    return %c0_i32, %c0_i32_0 : i32, i32
  }
  func.func @transform_7(%arg0: i32) -> (i32, i32) {
    %c0_i32 = arith.constant 0 : i32
    %c0_i32_0 = arith.constant 0 : i32
    %c0_i32_1 = arith.constant 0 : i32
    return %c0_i32, %c0_i32_0 : i32, i32
  }
  func.func @transform_8(%arg0: i32) -> (i32, i32) {
    %c0_i32 = arith.constant 0 : i32
    %c0_i32_0 = arith.constant 0 : i32
    %c0_i32_1 = arith.constant 0 : i32
    return %c0_i32, %c0_i32_0 : i32, i32
  }
  func.func @transform_9(%arg0: i32) -> (i32, i32) {
    %c0_i32 = arith.constant 0 : i32
    %c0_i32_0 = arith.constant 0 : i32
    %c0_i32_1 = arith.constant 0 : i32
    return %c0_i32, %c0_i32_0 : i32, i32
  }
  func.func @transform_10(%arg0: i32) -> (i32, i32) {
    %c0_i32 = arith.constant 0 : i32
    %c0_i32_0 = arith.constant 0 : i32
    %c0_i32_1 = arith.constant 0 : i32
    return %c0_i32, %c0_i32_0 : i32, i32
  }
  func.func @transform_11(%arg0: i32) -> (i32, i32) {
    %c0_i32 = arith.constant 0 : i32
    %c0_i32_0 = arith.constant 0 : i32
    %c0_i32_1 = arith.constant 0 : i32
    return %c0_i32, %c0_i32_0 : i32, i32
  }
  func.func @transform_12(%arg0: i32) -> (i32, i32) {
    %c0_i32 = arith.constant 0 : i32
    %c0_i32_0 = arith.constant 0 : i32
    %c0_i32_1 = arith.constant 0 : i32
    return %c0_i32, %c0_i32_0 : i32, i32
  }
  func.func @transform_13(%arg0: i32) -> (i32, i32) {
    %c0_i32 = arith.constant 0 : i32
    %c0_i32_0 = arith.constant 0 : i32
    %c0_i32_1 = arith.constant 0 : i32
    return %c0_i32, %c0_i32_0 : i32, i32
  }
  func.func @transform_14(%arg0: i32) -> (i32, i32) {
    %c0_i32 = arith.constant 0 : i32
    %c0_i32_0 = arith.constant 0 : i32
    %c0_i32_1 = arith.constant 0 : i32
    return %c0_i32, %c0_i32_0 : i32, i32
  }
  func.func @transform_15(%arg0: i32) -> (i32, i32) {
    %c0_i32 = arith.constant 0 : i32
    %c0_i32_0 = arith.constant 0 : i32
    %c0_i32_1 = arith.constant 0 : i32
    return %c0_i32, %c0_i32_0 : i32, i32
  }
  func.func @transform_16(%arg0: i32) -> (i32, i32) {
    %c0_i32 = arith.constant 0 : i32
    %c0_i32_0 = arith.constant 0 : i32
    %c0_i32_1 = arith.constant 0 : i32
    return %c0_i32, %c0_i32_0 : i32, i32
  }
  func.func @transform_17(%arg0: i32) -> (i32, i32, i32) {
    %c0_i32 = arith.constant 0 : i32
    %c0_i32_0 = arith.constant 0 : i32
    %c0_i32_1 = arith.constant 0 : i32
    return %arg0, %c0_i32, %c0_i32_0 : i32, i32, i32
  }
}

</mosaic_0001>

<bundles_post_ra>
// kernel: tpu_custom_call.1
= control target key start
LH: loop header
LB: loop body
LE: loop exit
PB: predicated region body
PF: predicated region fallthrough
CT: control target
= control target key end

     0   :  { %s2577_s0 = inlined_call_operand.hbm [shape: f32[2,8,32], index: 0, kind: input, shape index: {}]   ;;  %s2578_s1 = inlined_call_operand.vmem [shape: f32[1,32], index: 1, kind: input, shape index: {}]   ;;  %s2579_s2 = inlined_call_operand.vmem [shape: f32[1,32], index: 2, kind: input, shape index: {}]   ;;  %s2580_s3 = inlined_call_operand.vmem [shape: f32[32,32], index: 3, kind: input, shape index: {}]   ;;  %s2581_s4 = inlined_call_operand.vmem [shape: f32[1,32], index: 4, kind: input, shape index: {}]   ;;  %s2582_s5 = inlined_call_operand.vmem [shape: f32[32,32], index: 5, kind: input, shape index: {}]   ;;  %s2583_s6 = inlined_call_operand.vmem [shape: f32[1,32], index: 6, kind: input, shape index: {}]   ;;  %s2584_s7 = inlined_call_operand.vmem [shape: f32[32,32], index: 7, kind: input, shape index: {}]   ;;  %s2585_s8 = inlined_call_operand.vmem [shape: f32[1,32], index: 8, kind: input, shape index: {}]   ;;  %s2586_s9 = inlined_call_operand.vmem [shape: f32[32,32], index: 9, kind: input, shape index: {}]   ;;  %s2587_s10 = inlined_call_operand.vmem [shape: f32[1,32], index: 10, kind: input, shape index: {}]   ;;  %s2588_s11 = inlined_call_operand.vmem [shape: f32[1,32], index: 11, kind: input, shape index: {}]   ;;  %s2589_s12 = inlined_call_operand.vmem [shape: f32[1,32], index: 12, kind: input, shape index: {}]   ;;  %s2590_s13 = inlined_call_operand.vmem [shape: f32[32,128], index: 13, kind: input, shape index: {}]   ;;  %s2591_s14 = inlined_call_operand.vmem [shape: f32[1,128], index: 14, kind: input, shape index: {}]   ;;  %s2592_s15 = inlined_call_operand.vmem [shape: f32[128,32], index: 15, kind: input, shape index: {}]   ;;  %s2593_s16 = inlined_call_operand.vmem [shape: f32[1,32], index: 16, kind: input, shape index: {}]   ;;  %s2594_s17 = inlined_call_operand.hbm [shape: f32[2,8,32], index: 17, kind: output, shape index: {}]  }
   0x1   :  { %2603 = sst [smem:[#allocation12_spill]] %s2577_s0 }
   0x2   :  { %2604 = sst [smem:[#allocation13_spill]] %s2578_s1 }
   0x3   :  { %2605 = sst [smem:[#allocation14_spill]] %s2579_s2 }
   0x4   :  { %2606 = sst [smem:[#allocation15_spill]] %s2591_s14 }
   0x5   :  { %2607 = sst [smem:[#allocation16_spill]] %s2593_s16 }
   0x6   :  { %2608 = sst [smem:[#allocation17_spill]] %s2594_s17 }
   0x7   :  { %22 = vsyncpa [#allocation3], 0 }
   0x8   :  { %24 = vsyncpa [#allocation3 + $0x1], 0 }
   0x9   :  { %25 = vsyncpa [#allocation4], 0 }
   0xa   :  { %27 = vsyncpa [#allocation4 + $0x1], 0  ;;  %s2131_s24 = smov 0   ;;  %s2133_s25 = smov 0  }
   0xb   :  { %s2135_s26 = smov 0   ;;  %s2137_s27 = smov 0  }
   0xc LB: > { %2609 = sst [smem:[#allocation8_spill]] %s2020_s24  ;;  %s2152_s28 = sadd.s32 4294967295, %s2032_s27   ;;  %s2032_s27 = sphi %s2137_s27, %s2632_s27   ;;  %s2028_s26 = sphi %s2135_s26, %s2636_s26   ;;  %s2024_s25 = sphi %s2133_s25, %s2635_s25   ;;  %s2020_s24 = sphi %s2131_s24, %s2634_s24  }
   0xd   : > { %s1658_s29 = sadd.s32 4294967294, %s2032_s27   ;;  %s2156_s0 = sadd.s32 1, %s2032_s27  }
   0xe   : > { %2610 = sst [smem:[#allocation9_spill]] %s2156_s0  ;;  %s40_s30 = sadd.s32 1, %s2028_s26 }
   0xf   : > { %s37_s18 = ssub.s32 %s2032_s27, %s2156_s0  ;;  %p47_p0 = scmp.ne.s32.totalorder %s2028_s26, %s2024_s25 }
  0x10   : > { %p38_p1 = scmp.eq.s32.totalorder %s37_s18, 0  ;;  %p48_p2 = scmp.eq.s32.totalorder %s2032_s27, 0 }
  0x11   : > { %p53_p3 = scmp.ne.s32.totalorder %s2024_s25, %s2020_s24  ;;  %p54_p4 = scmp.eq.s32.totalorder %s2152_s28, 0 }
  0x12   : > { %s2168_s19 = scalar_select %p38_p1, %s2028_s26, %s40_s30  }
  0x13   : > { %p2170_p5 = por %p48_p2, %p47_p0  ;;  %p2174_p6 = por %p54_p4, %p53_p3 }
  0x14   : > { %2611 = sst [smem:[#allocation10_spill]] %s2168_s19  ;;  %p413_p7 = scmp.eq.s32.totalorder %s2152_s28, 1 }
  0x15   : > { %p419_p8 = scmp.eq.s32.totalorder %s1658_s29, 1  ;;  %p1877_p10 = scmp.lt.s32.totalorder %s2032_s27, 2 }
  0x16   : > { %p2181_p11 = por %p413_p7, %p47_p0  ;;  %s487_s23 = sand.u32 1, %s2028_s26  }
  0x17   : > { %p2185_p12 = por %p419_p8, %p53_p3  ;;  %s1662_s30 = sshll.u32 %s2032_s27, 7 }
  0x18   : > { %s2614_s21 = scalar_select %p2181_p11, 1, 0 }
  0x19   : > { %s2616_s22 = scalar_select %p2185_p12, 1, 0 }
  0x1a   : > { %2615 = sst [smem:[#allocation11_spill]] %s2614_s21  ;;  %s1661_s18 = sshll.u32 %s487_s23, 3 }
  0x1b   : > { %s2617_s24 = sld [smem:[#allocation12_spill]]  ;;  %s491_s29 = scalar_lea.vmem [#allocation2], %s1661_s18 }
  0x1c   : > { %s498_s14 = sshll.u32 %s491_s29, 4  ;;  %p2198_p13 = pnand %p1877_p10, %p2170_p5  ;;  %s2202_s14 = int_to_ptr.vmem [resolvable:$true] %s498_s14 }
  0x1d   : > { %s488_s0 = scalar_lea.sflag [#allocation3], %s487_s23 }
  0x1e   : > { %p1938_p3 = pneg %p2198_p13 }
  0x21   : > { %s2618_s17 = smov %s2617_s24  ;;  %s2194_s16 = scalar_lea.hbm %s2617_s24, %s1662_s30 }
  0x22   : > { %s1936_s24 = scalar_lea.hbm %s2194_s16, 128  ;;  %s1941_s30 = scalar_lea.hbm %s2618_s17, 256 }
  0x23   : > { %p1937_p2 = scmp.ne.s32.totalorder %s2194_s16, %s1936_s24  ;;  %p1942_p5 = scmp.lt.u32.totalorder %s2194_s16, %s2618_s17 }
  0x24   : > { %p1943_p8 = scmp.lt.u32.totalorder %s1941_s30, %s1936_s24  ;;  %p1945_p9 = scmp.lt.u32.totalorder %s1936_s24, %s2194_s16 }
  0x25   : > { %p1939_p4 = pnand %p1938_p3, %p1937_p2 }
  0x26   : > { %p1944_p10 = por %p1943_p8, %p1942_p5 }
  0x27   : > { %p1940_p7 = pneg %p1939_p4 }
  0x28   : > { %p1946_p0 = por %p1945_p9, %p1944_p10 }
  0x2a   : > { %p1947_p1 = pnand %p1946_p0, %p1940_p7 }
  0x2c   : > { %1950 = shalt.err (!%p1947_p1)
}
  0x2d   : > { %s1951_s23 = scalar_lea.vmem %s2202_s14, 128  ;;  %s2034_s19 = smov [#allocation2]  }
  0x2e   : > { %p1952_p2 = scmp.ne.s32.totalorder %s2202_s14, %s1951_s23  ;;  %s1956_s1 = sshll.u32 %s2034_s19, 4  ;;  %s1957_s1 = int_to_ptr.vmem [resolvable:$false] %s1956_s1 }
  0x2f   : > { %s1958_s18 = scalar_lea.vmem %s1957_s1, 256  ;;  %p1959_p11 = scmp.lt.s32.totalorder %s2202_s14, %s1957_s1 }
  0x30   : > { %p1954_p4 = pnand %p1952_p2, %p1938_p3  ;;  %p1960_p5 = scmp.lt.s32.totalorder %s1958_s18, %s1951_s23 }
  0x32   : > { %p1955_p12 = pneg %p1954_p4  ;;  %p1961_p8 = por %p1960_p5, %p1959_p11 }
  0x34   : > { %p1962_p9 = pnand %p1961_p8, %p1955_p12 }
  0x36   : > { %1965 = shalt.err (!%p1962_p9)
}
  0x37   : > { %1872 = dma.hbm_to_vmem [thread:$0]  (!%p2198_p13), %s2194_s16, 128, %s2202_s14, %s488_s0  }
  0x38   : > { %p2620_p0 = scmp.lt.s32.totalorder %s2032_s27, 3  ;;  %p2621_p1 = scmp.ge.s32.totalorder %s2032_s27, 1 }
  0x3a   : > { %p504_p3 = pnand %p2621_p1, %p2620_p0 }
  0x3b   : > { %s2236_s24 = sand.u32 (!%p504_p3), 1, %s2024_s25  }
  0x3c   : > { %507 = sbr.rel (%p504_p3) target bundleno = 3746 (0xea2), region = 88  ;;  %s1664_s30 = sshll.u32 (!%p504_p3), %s2236_s24, 3 }
  0x3d   : > { %s510_s29 = scalar_lea.sflag (!%p504_p3), [#allocation3], %s2236_s24  ;;  %s513_s21 = scalar_lea.vmem (!%p504_p3), [#allocation2], %s1664_s30 }
  0x43   : > { %2011 = dma.done.wait (%p2174_p6), %s510_s29, 128  }
  0x44   : > { %2013 = vsyncadd (%p2174_p6), %s510_s29, 4294967168  ;;  %vm568_vm0 = vcmask 261120   ;;  %v2246_v0 = vld [vmem:[%s513_s21] sm:$0xff]  ;;  %v600_v9 = vld [vmem:[%s2580_s3 + $0x10] sm:$0xff]  ;;  %v2035_v10 = vmov 0.0   ;;  %vm2036_vm1 = vmmov 0  }
  0x45   : > { %v569_v1 = vsel %vm568_vm0, %v2246_v0, 0.0  ;;  %v598_v7 = vld [vmem:[%s2580_s3] sm:$0xff]  ;;  %v599_v8 = vld [vmem:[%s2580_s3 + $0x8] sm:$0xff]  ;;  %1741 = vmatprep.subr.bf16.mxu1 %v2035_v10  ;;  %v601_v12 = vld [vmem:[%s2580_s3 + $0x18] sm:$0xff]  ;;  %1745 = vmatprep.mubr.msk.bf16.mxu1 %vm2036_vm1, %v2035_v10  ;;  %s2622_s14 = sld [smem:[#allocation13_spill]]  ;;  %s2623_s2 = sld [smem:[#allocation14_spill]] }
  0x46   : > { %570 = vadd.xlane.f32.xlu0 %v569_v1  ;;  %v602_v11 = vpack.c.bf16 %v599_v8, %v598_v7  ;;  %1771 = vmatprep.subr.bf16.mxu0 %v2035_v10  ;;  %v603_v13 = vpack.c.bf16 %v601_v12, %v600_v9  ;;  %v654_v22 = vld [vmem:[%s2582_s5] sm:$0xff]  ;;  %v655_v23 = vld [vmem:[%s2582_s5 + $0x8] sm:$0xff]  ;;  %v656_v27 = vld [vmem:[%s2582_s5 + $0x10] sm:$0xff]  ;;  %vm763_vm2 = vcmask 64512   ;;  %s2037_s0 = smov 120   ;;  %vm826_vm3 = vcmask 1043456  }
  0x47   : > { %1773 = vmatprep.mubr.msk.bf16.mxu0 %vm2036_vm1, %v2035_v10  ;;  %v658_v25 = vpack.c.bf16 %v655_v23, %v654_v22  ;;  %v657_v28 = vld [vmem:[%s2582_s5 + $0x18] sm:$0xff]  ;;  %v707_v30 = vld [vmem:[%s2584_s7] sm:$0xff]  ;;  %v708_v31 = vld [vmem:[%s2584_s7 + $0x8] sm:$0xff]  ;;  %s2038_s1 = smov 112   ;;  %s2039_s16 = smov 104  }
  0x48   : > { %1742 = vmatpush3.bf16.msra.mxu1 %v602_v11  ;;  %v659_v29 = vpack.c.bf16 %v657_v28, %v656_v27  ;;  %v711_v32 = vpack.c.bf16 %v708_v31, %v707_v30  ;;  %v709_v33 = vld [vmem:[%s2584_s7 + $0x10] sm:$0xff]  ;;  %v710_v34 = vld [vmem:[%s2584_s7 + $0x18] sm:$0xff]  ;;  %v1670_v40 = vld [vmem:[%s2583_s6] ss:$0 sm:$0xff]  ;;  %s2624_s23 = sld [smem:[#allocation15_spill]]  ;;  %s2625_s18 = sld [smem:[#allocation16_spill]] }
  0x49   : > { %1743 = vmatprep.subr.bf16.mxu1 %v2035_v10  ;;  %v712_v35 = vpack.c.bf16 %v710_v34, %v709_v33  ;;  %v1668_v41 = vld [vmem:[%s2581_s4] ss:$0 sm:$0xff]  ;;  %s2626_s29 = sld [smem:[#allocation11_spill]]  ;;  %s1693_s21 = sshll.u32 %s2152_s28, 7 }
  0x4a   : > { %v1672_v50 = vld [vmem:[%s2585_s8] ss:$0 sm:$0xff]  ;;  %s1575_s28 = scalar_lea.sflag [#allocation4], %s2236_s24  ;;  %s2040_s19 = smov [#allocation5]  }
  0x4b   : > { %v1666_v18 = vld [vmem:[%s2622_s14] ss:$0 sm:$0xff]  ;;  %s563_s14 = scalar_lea.vmem [#allocation5], %s1664_s30 }
  0x4c   : > { %1744 = vmatpush3.bf16.msra.mxu1 %v603_v13  ;;  %v1667_v20 = vld [vmem:[%s2623_s2] ss:$0 sm:$0xff] }
  0x4d   : > { %1749 = vmatprep.subr.bf16.mxu1 %v2035_v10 }
  0x4f   : > { %p2628_p11 = scmp.ne.s32.totalorder %s2626_s29, 0 }
  0xd3   : > { %v571_v2 = vpop.xlane.xlu0 %570 }
  0xd4   : > { %v573_v3 = vmul.f32 0.03125, %v571_v2 }
  0xd6   : > { %v574_v4 = vsub.f32 %v2246_v0, %v573_v3 }
  0xd8   : > { %v575_v5 = vmul.f32 %v574_v4, %v574_v4 }
  0xda   : > { %v576_v6 = vsel %vm568_vm0, %v575_v5, 0.0 }
  0xdb   : > { %577 = vadd.xlane.f32.xlu0 %v576_v6 }
 0x168   : > { %v578_v14 = vpop.xlane.xlu0 %577 }
 0x169   : > { %v579_v15 = vmul.f32 0.03125, %v578_v14 }
 0x16b   : > { %v580_v16 = vadd.f32 1e-05, %v579_v15 }
 0x16d   : > { %1916 = vrsqrt.f32 %v580_v16 }
 0x177   : > { %v1917_v17 = vpop.eup %1916 }
 0x178   : > { %v582_v19 = vmul.f32 %v1917_v17, %v574_v4 }
 0x17a   : > { %v589_v21 = vmul.f32 %v1666_v18, %v582_v19 }
 0x17c   : > { %v596_v24 = vadd.f32 %v1667_v20, %v589_v21 }
 0x17e   : > { %v597_v26 = vpack.c.bf16 %v596_v24, %v596_v24 }
 0x180   : > { %1746 = vmatmul.mubr.msk.bf16.vlgmr.msra.gmra.mrb[0].mxu1 %vm568_vm0, %v597_v26 }
 0x181   : > { %1750 = vmatpush3.bf16.msra.mxu1 %v658_v25  ;;  %1753 = vmatprep.mubr.msk.bf16.mxu1 %vm2036_vm1, %v2035_v10 }
 0x182   : > { %1751 = vmatprep.subr.bf16.mxu1 %v2035_v10 }
 0x185   : > { %1752 = vmatpush3.bf16.msra.mxu1 %v659_v29 }
 0x186   : > { %1757 = vmatprep.subr.bf16.mxu1 %v2035_v10 }
 0x188   : > { %1754 = vmatmul.mubr.msk.bf16.vlgmr.msra.gmra.mrb[4].mxu1 %vm568_vm0, %v597_v26 }
 0x189   : > { %1758 = vmatpush3.bf16.msra.mxu1 %v711_v32  ;;  %1761 = vmatprep.mubr.msk.bf16.mxu1 %vm2036_vm1, %v2035_v10  ;;  %v871_v32 = vld [vmem:[%s2586_s9] sm:$0xff] }
 0x18a   : > { %1759 = vmatprep.subr.bf16.mxu1 %v2035_v10  ;;  %v872_v33 = vpack.c.bf16 %v871_v32, %v871_v32 }
 0x18d   : > { %1760 = vmatpush3.bf16.msra.mxu1 %v712_v35 }
 0x18e   : > { %1765 = vmatprep.subr.bf16.mxu1 %v2035_v10 }
 0x190   : > { %1762 = vmatmul.mubr.msk.bf16.vlgmr.msra.gmra.mrb[8].mxu1 %vm568_vm0, %v597_v26  ;;  %v988_v26 = vld [vmem:[%s2586_s9 + $0x8] sm:$0xff] }
 0x191   : > { %1767 = vmatprep.mubr.msk.bf16.mxu1 %vm2036_vm1, %v2035_v10  ;;  %v989_v27 = vpack.c.bf16 %v988_v26, %v988_v26 }
 0x193   : > { %v994_v28 = vsel %vm826_vm3, %v989_v27, 0 }
 0x253   : > { %v648_v36 = vpop.f32.mrb[0].mxu1 }
 0x254   : > { %v1747_v37 = vpop.f32.mrb[1].mxu1  ;;  %v649_v46 = vadd.f32 %v1668_v41, %v648_v36 }
 0x255   : > { %v651_v38 = vpop.f32.mrb[2].mxu1  ;;  %v1040_v37 = vsel %vm826_vm3, %v872_v33, 0 }
 0x256   : > { %v1748_v39 = vpop.f32.mrb[3].mxu1  ;;  %v2330_v51 = vpack.c.bf16 %v649_v46, %v649_v46 }
 0x25b   : > { %v701_v42 = vpop.f32.mrb[4].mxu1 }
 0x25c   : > { %v702_v43 = vadd.f32 %v1670_v40, %v701_v42  ;;  %v1755_v44 = vpop.f32.mrb[5].mxu1 }
 0x25d   : > { %v704_v45 = vpop.f32.mrb[6].mxu1 }
 0x25e   : > { %v2321_v47 = vpack.c.bf16 %v702_v43, %v702_v43  ;;  %v1756_v48 = vpop.f32.mrb[7].mxu1 }
 0x260   : > { %877 = vrot.lane.b32.xlu1 %v2321_v47, %s2037_s0  ;;  %v768_v49 = vsel %vm763_vm2, %v2321_v47, 0 }
 0x261   : > { %1766 = vmatpush3.bf16.xpose.msra.mxu1 %v768_v49 }
 0x262   : > { %1777 = vmatprep.subr.bf16.mxu1 %v2035_v10 }
 0x263   : > { %v754_v52 = vpop.f32.mrb[8].mxu1 }
 0x264   : > { %v755_v53 = vadd.f32 %v1672_v50, %v754_v52  ;;  %874 = vrot.lane.b32.xlu1 %v2330_v51, %s2037_s0  ;;  %v1763_v54 = vpop.f32.mrb[9].mxu1 }
 0x265   : > { %v757_v55 = vpop.f32.mrb[10].mxu1 }
 0x266   : > { %v2335_v56 = vpack.c.bf16 %v755_v53, %v755_v53  ;;  %v1764_v57 = vpop.f32.mrb[11].mxu1 }
 0x268   : > { %1768 = vmatmul.mubr.msk.bf16.vlgmr.msra.gmra.mrb[12].mxu1 %vm763_vm2, %v2330_v51  ;;  %v828_v58 = vsel %vm826_vm3, %v2335_v56, 0 }
 0x269   : > { %1772 = vmatpush3.bf16.msra.mxu0 %v828_v58  ;;  %1779 = vmatprep.mubr.msk.bf16.mxu1 %vm2036_vm1, %v2035_v10 }
 0x26a   : > { %1783 = vmatprep.subr.bf16.mxu0 %v2035_v10 }
 0x2d2   : > { %v878_v59 = vpop.permute.xlu1 %877 }
 0x2d3   : > { %v883_v60 = vsel %vm763_vm2, %v878_v59, 0 }
 0x2d4   : > { %1778 = vmatpush3.bf16.xpose.msra.mxu1 %v883_v60 }
 0x2d5   : > { %1789 = vmatprep.subr.bf16.mxu1 %v2035_v10 }
 0x2d6   : > { %v875_v61 = vpop.permute.xlu1 %874 }
 0x2db   : > { %1780 = vmatmul.mubr.msk.bf16.vlgmr.msra.gmra.mrb[16].mxu1 %vm763_vm2, %v875_v61 }
 0x2dc   : > { %1791 = vmatprep.mubr.msk.bf16.mxu1 %vm2036_vm1, %v2035_v10  ;;  %1790 = vmatpush3.bf16.msra.mxu1 %v994_v28 }
 0x2dd   : > { %1801 = vmatprep.subr.bf16.mxu1 %v2035_v10 }
 0x33b   : > { %v804_v62 = vpop.f32.mrb[12].mxu1 }
 0x33c   : > { %v810_v63 = vmul.f32 0.35355338, %v804_v62  ;;  %v1769_v1 = vpop.f32.mrb[13].mxu1 }
 0x33d   : > { %v807_v2 = vpop.f32.mrb[14].mxu1 }
 0x33e   : > { %v1770_v3 = vpop.f32.mrb[15].mxu1  ;;  %v811_v4 = vsel %vm763_vm2, %v810_v63, -inf }
 0x33f   : > { %812 = vmax.xlane.f32.xlu0 %v811_v4 }
 0x3ae   : > { %v919_v5 = vpop.f32.mrb[16].mxu1 }
 0x3af   : > { %v925_v6 = vmul.f32 0.35355338, %v919_v5  ;;  %v1781_v7 = vpop.f32.mrb[17].mxu1 }
 0x3b0   : > { %v922_v8 = vpop.f32.mrb[18].mxu1 }
 0x3b1   : > { %v1782_v9 = vpop.f32.mrb[19].mxu1  ;;  %v926_v11 = vsel %vm763_vm2, %v925_v6, -inf }
 0x3b2   : > { %927 = vmax.xlane.f32.xlu1 %v926_v11 }
 0x3c3   : > { %1082 = vrot.lane.b32.xlu1 %v2330_v51, %s2038_s1 }
 0x3cc   : > { %v813_v12 = vpop.xlane.xlu0 %812 }
 0x3cd   : > { %v814_v13 = vsub.f32 %v810_v63, %v813_v12 }
 0x3cf   : > { %v815_v14 = vmul.f32 1.442695, %v814_v13 }
 0x3d1   : > { %1918 = vpow2.f32 %v815_v14 }
 0x3db   : > { %v1919_v15 = vpop.eup %1918 }
 0x3dc   : > { %v817_v16 = vsel %vm763_vm2, %v1919_v15, 0.0 }
 0x3dd   : > { %818 = vadd.xlane.f32.xlu0 %v817_v16 }
 0x43f   : > { %v928_v17 = vpop.xlane.xlu1 %927 }
 0x440   : > { %v929_v18 = vsub.f32 %v925_v6, %v928_v17 }
 0x442   : > { %v930_v19 = vmul.f32 1.442695, %v929_v18 }
 0x443   : > { %v1083_v52 = vpop.permute.xlu1 %1082 }
 0x444   : > { %1920 = vpow2.f32 %v930_v19 }
 0x44e   : > { %v1921_v20 = vpop.eup %1920 }
 0x44f   : > { %v932_v21 = vsel %vm763_vm2, %v1921_v20, 0.0 }
 0x450   : > { %933 = vadd.xlane.f32.xlu0 %v932_v21 }
 0x466   : > { %939 = vrot.lane.b32.xlu0 %v2335_v56, %s2037_s0 }
 0x46a   : > { %v819_v22 = vpop.xlane.xlu0 %818  ;;  %1084 = vrot.lane.b32.xlu0 %v2321_v47, %s2038_s1 }
 0x46b   : > { %1922 = vrcp.f32 %v819_v22 }
 0x475   : > { %v1923_v23 = vpop.eup %1922 }
 0x476   : > { %v821_v24 = vmul.f32 %v1923_v23, %v1919_v15 }
 0x478   : > { %v822_v25 = vpack.c.bf16 %v821_v24, %v821_v24 }
 0x47a   : > { %1774 = vmatmul.mubr.msk.bf16.vlgmr.msra.gmra.mrb[0].mxu0 %vm763_vm2, %v822_v25 }
 0x47b   : > { %1785 = vmatprep.mubr.msk.bf16.mxu0 %vm2036_vm1, %v2035_v10 }
 0x4dd   : > { %v934_v29 = vpop.xlane.xlu0 %933 }
 0x4de   : > { %1924 = vrcp.f32 %v934_v29 }
 0x4e1   : > { %v940_v30 = vpop.permute.xlu0 %939 }
 0x4e2   : > { %v945_v31 = vsel %vm826_vm3, %v940_v30, 0 }
 0x4e3   : > { %1784 = vmatpush3.bf16.msra.mxu0 %v945_v31 }
 0x4e4   : > { %1795 = vmatprep.subr.bf16.mxu0 %v2035_v10 }
 0x4e5   : > { %v1085_v43 = vpop.permute.xlu0 %1084 }
 0x4e6   : > { %v1090_v49 = vsel %vm763_vm2, %v1085_v43, 0 }
 0x4e8   : > { %v1925_v34 = vpop.eup %1924 }
 0x4e9   : > { %v936_v35 = vmul.f32 %v1925_v34, %v1921_v20 }
 0x4eb   : > { %v937_v36 = vpack.c.bf16 %v936_v35, %v936_v35 }
 0x4ed   : > { %1786 = vmatmul.mubr.msk.bf16.vlgmr.msra.gmra.mrb[4].mxu0 %vm763_vm2, %v937_v36 }
 0x4ee   : > { %1796 = vmatpush3.bf16.msra.mxu0 %v1040_v37  ;;  %1797 = vmatprep.mubr.msk.bf16.mxu0 %vm2036_vm1, %v2035_v10 }
 0x4ef   : > { %1807 = vmatprep.subr.bf16.mxu0 %v2035_v10 }
 0x54d   : > { %v864_v38 = vpop.f32.mrb[0].mxu0 }
 0x54e   : > { %v870_v39 = vpack.c.bf16 %v864_v38, %v864_v38  ;;  %v1775_v40 = vpop.f32.mrb[1].mxu0 }
 0x54f   : > { %v867_v41 = vpop.f32.mrb[2].mxu0  ;;  %v1355_v40 = vld [vmem:[%s2586_s9 + $0x18] sm:$0xff] }
 0x550   : > { %v1776_v42 = vpop.f32.mrb[3].mxu0  ;;  %1798 = vmatmul.mubr.msk.bf16.vlgmr.msra.gmra.mrb[8].mxu0 %vm763_vm2, %v870_v39  ;;  %v1356_v41 = vpack.c.bf16 %v1355_v40, %v1355_v40 }
 0x551   : > { %1809 = vmatprep.mubr.msk.bf16.mxu0 %vm2036_vm1, %v2035_v10 }
 0x5c0   : > { %v981_v44 = vpop.f32.mrb[4].mxu0 }
 0x5c1   : > { %v987_v45 = vpack.c.bf16 %v981_v44, %v981_v44  ;;  %v1787_v46 = vpop.f32.mrb[5].mxu0 }
 0x5c2   : > { %v984_v48 = vpop.f32.mrb[6].mxu0 }
 0x5c3   : > { %v1788_v50 = vpop.f32.mrb[7].mxu0  ;;  %1792 = vmatmul.mubr.msk.bf16.vlgmr.msra.gmra.mrb[20].mxu1 %vm763_vm2, %v987_v45 }
 0x5c4   : > { %1802 = vmatpush3.bf16.xpose.msra.mxu1 %v1090_v49  ;;  %1803 = vmatprep.mubr.msk.bf16.mxu1 %vm2036_vm1, %v2035_v10 }
 0x5c5   : > { %1813 = vmatprep.subr.bf16.mxu1 %v2035_v10 }
 0x5cb   : > { %1804 = vmatmul.mubr.msk.bf16.vlgmr.msra.gmra.mrb[24].mxu1 %vm763_vm2, %v1083_v52 }
 0x5cc   : > { %1815 = vmatprep.mubr.msk.bf16.mxu1 %vm2036_vm1, %v2035_v10 }
 0x623   : > { %v1076_v53 = vpop.f32.mrb[8].mxu0 }
 0x624   : > { %v1799_v54 = vpop.f32.mrb[9].mxu0 }
 0x625   : > { %v1079_v55 = vpop.f32.mrb[10].mxu0 }
 0x626   : > { %v1800_v57 = vpop.f32.mrb[11].mxu0 }
 0x696   : > { %v1030_v58 = vpop.f32.mrb[20].mxu1 }
 0x697   : > { %v2388_v59 = vadd.f32 %v1076_v53, %v1030_v58  ;;  %v1793_v60 = vpop.f32.mrb[21].mxu1 }
 0x698   : > { %v1033_v61 = vpop.f32.mrb[22].mxu1 }
 0x699   : > { %v1794_v62 = vpop.f32.mrb[23].mxu1 }
 0x69a   : > { %v1686_v62 = vld [vmem:[%s2587_s10] ss:$0 sm:$0xff] }
 0x69e   : > { %v1126_v63 = vpop.f32.mrb[24].mxu1 }
 0x69f   : > { %v1132_v1 = vmul.f32 0.35355338, %v1126_v63  ;;  %v1805_v2 = vpop.f32.mrb[25].mxu1 }
 0x6a0   : > { %v1129_v3 = vpop.f32.mrb[26].mxu1 }
 0x6a1   : > { %v1806_v4 = vpop.f32.mrb[27].mxu1  ;;  %v1133_v5 = vsel %vm763_vm2, %v1132_v1, -inf }
 0x6a2   : > { %1134 = vmax.xlane.f32.xlu0 %v1133_v5 }
 0x6b8   : > { %1145 = vrot.lane.b32.xlu0 %v2335_v56, %s2038_s1  ;;  %s1970_s1 = sshll.u32 %s2040_s19, 4  ;;  %s1971_s1 = int_to_ptr.vmem [resolvable:$false] %s1970_s1 }
 0x6bc   : > { %1243 = vrot.lane.b32.xlu0 %v2330_v51, %s2039_s16 }
 0x72f   : > { %v1135_v6 = vpop.xlane.xlu0 %1134 }
 0x730   : > { %v1136_v7 = vsub.f32 %v1132_v1, %v1135_v6 }
 0x732   : > { %v1137_v8 = vmul.f32 1.442695, %v1136_v7 }
 0x733   : > { %v1146_v9 = vpop.permute.xlu0 %1145 }
 0x734   : > { %1926 = vpow2.f32 %v1137_v8  ;;  %v1151_v11 = vsel %vm826_vm3, %v1146_v9, 0 }
 0x735   : > { %1808 = vmatpush3.bf16.msra.mxu0 %v1151_v11  ;;  %v1443_v11 = vld [vmem:[%s2590_s13] sm:$0xff] }
 0x736   : > { %1819 = vmatprep.subr.bf16.mxu0 %v2035_v10 }
 0x737   : > { %v1244_v19 = vpop.permute.xlu0 %1243 }
 0x73e   : > { %v1927_v12 = vpop.eup %1926 }
 0x73f   : > { %v1139_v13 = vsel %vm763_vm2, %v1927_v12, 0.0 }
 0x740   : > { %1140 = vadd.xlane.f32.xlu1 %v1139_v13  ;;  %v1445_v13 = vld [vmem:[%s2590_s13 + $0x10] sm:$0xff] }
 0x751   : > { %1245 = vrot.lane.b32.xlu1 %v2321_v47, %s2039_s16  ;;  %v1194_v47 = vld [vmem:[%s2586_s9 + $0x10] sm:$0xff] }
 0x752   : > { %v1195_v20 = vpack.c.bf16 %v1194_v47, %v1194_v47 }
 0x754   : > { %v1200_v21 = vsel %vm826_vm3, %v1195_v20, 0  ;;  %v1505_v20 = vld [vmem:[%s2592_s15 + $0x20] sm:$0xff] }
 0x755   : > { %1814 = vmatpush3.bf16.msra.mxu1 %v1200_v21  ;;  %v1506_v21 = vld [vmem:[%s2592_s15 + $0x28] sm:$0xff] }
 0x756   : > { %1825 = vmatprep.subr.bf16.mxu1 %v2035_v10 }
 0x7cd   : > { %v1141_v14 = vpop.xlane.xlu1 %1140 }
 0x7ce   : > { %1928 = vrcp.f32 %v1141_v14  ;;  %v1446_v14 = vld [vmem:[%s2590_s13 + $0x18] sm:$0xff] }
 0x7d1   : > { %v1246_v16 = vpop.permute.xlu1 %1245 }
 0x7d2   : > { %v1251_v18 = vsel %vm763_vm2, %v1246_v16, 0  ;;  %v1502_v16 = vld [vmem:[%s2592_s15 + $0x8] sm:$0xff] }
 0x7d8   : > { %v1929_v51 = vpop.eup %1928 }
 0x7d9   : > { %v1143_v15 = vmul.f32 %v1929_v51, %v1927_v12  ;;  %v1448_v51 = vpack.c.bf16 %v1446_v14, %v1445_v13 }
 0x7db   : > { %v1144_v17 = vpack.c.bf16 %v1143_v15, %v1143_v15  ;;  %v1501_v15 = vld [vmem:[%s2592_s15] sm:$0xff] }
 0x7dd   : > { %1810 = vmatmul.mubr.msk.bf16.vlgmr.msra.gmra.mrb[12].mxu0 %vm763_vm2, %v1144_v17  ;;  %v1503_v17 = vld [vmem:[%s2592_s15 + $0x10] sm:$0xff] }
 0x7de   : > { %1820 = vmatpush3.bf16.xpose.msra.mxu0 %v1251_v18  ;;  %1821 = vmatprep.mubr.msk.bf16.mxu0 %vm2036_vm1, %v2035_v10  ;;  %v1517_v18 = vpack.c.bf16 %v1502_v16, %v1501_v15 }
 0x7df   : > { %1831 = vmatprep.subr.bf16.mxu0 %v2035_v10 }
 0x7e5   : > { %1822 = vmatmul.mubr.msk.bf16.vlgmr.msra.gmra.mrb[16].mxu0 %vm763_vm2, %v1244_v19  ;;  %v1504_v19 = vld [vmem:[%s2592_s15 + $0x18] sm:$0xff] }
 0x7e6   : > { %1833 = vmatprep.mubr.msk.bf16.mxu0 %vm2036_vm1, %v2035_v10  ;;  %v1518_v47 = vpack.c.bf16 %v1504_v19, %v1503_v17 }
 0x8b0   : > { %v1187_v22 = vpop.f32.mrb[12].mxu0 }
 0x8b1   : > { %v1193_v23 = vpack.c.bf16 %v1187_v22, %v1187_v22  ;;  %v1811_v24 = vpop.f32.mrb[13].mxu0  ;;  %v1519_v22 = vpack.c.bf16 %v1506_v21, %v1505_v20 }
 0x8b2   : > { %v1190_v25 = vpop.f32.mrb[14].mxu0  ;;  %v1508_v24 = vld [vmem:[%s2592_s15 + $0x38] sm:$0xff] }
 0x8b3   : > { %v1812_v26 = vpop.f32.mrb[15].mxu0  ;;  %1816 = vmatmul.mubr.msk.bf16.vlgmr.msra.gmra.mrb[28].mxu1 %vm763_vm2, %v1193_v23  ;;  %v1507_v23 = vld [vmem:[%s2592_s15 + $0x30] sm:$0xff] }
 0x8b4   : > { %1827 = vmatprep.mubr.msk.bf16.mxu1 %vm2036_vm1, %v2035_v10  ;;  %v1520_v25 = vpack.c.bf16 %v1508_v24, %v1507_v23  ;;  %v1509_v26 = vld [vmem:[%s2592_s15 + $0x40] sm:$0xff] }
 0x8b8   : > { %v1287_v27 = vpop.f32.mrb[16].mxu0 }
 0x8b9   : > { %v1293_v28 = vmul.f32 0.35355338, %v1287_v27  ;;  %v1823_v29 = vpop.f32.mrb[17].mxu0  ;;  %v1510_v27 = vld [vmem:[%s2592_s15 + $0x48] sm:$0xff] }
 0x8ba   : > { %v1290_v30 = vpop.f32.mrb[18].mxu0  ;;  %v1511_v29 = vld [vmem:[%s2592_s15 + $0x50] sm:$0xff] }
 0x8bb   : > { %v1824_v31 = vpop.f32.mrb[19].mxu0  ;;  %v1294_v32 = vsel %vm763_vm2, %v1293_v28, -inf  ;;  %v1512_v30 = vld [vmem:[%s2592_s15 + $0x58] sm:$0xff] }
 0x8bc   : > { %1295 = vmax.xlane.f32.xlu0 %v1294_v32  ;;  %v1522_v31 = vpack.c.bf16 %v1512_v30, %v1511_v29 }
 0x8d2   : > { %1306 = vrot.lane.b32.xlu0 %v2335_v56, %s2039_s16  ;;  %v1361_v56 = vsel %vm826_vm3, %v1356_v41, 0  ;;  %s1588_s16 = sshll.u32 %s563_s14, 4  ;;  %s2534_s16 = int_to_ptr.vmem [resolvable:$true] %s1588_s16 }
 0x8d3   : > { %1832 = vmatpush3.bf16.msra.mxu0 %v1361_v56  ;;  %v1513_v56 = vld [vmem:[%s2592_s15 + $0x60] sm:$0xff]  ;;  %s1966_s30 = scalar_lea.vmem %s2534_s16, 128  ;;  %p1973_p7 = scmp.lt.s32.totalorder %s2534_s16, %s1971_s1 }
 0x8d4   : > { %1845 = vmatprep.subr.bf16.mxu0 %v2035_v10  ;;  %p1967_p6 = scmp.ne.s32.totalorder %s2534_s16, %s1966_s30 }
 0x8d6   : > { %p1968_p12 = pnand %p1967_p6, %p2628_p11 }
 0x8d8   : > { %p1969_p13 = pneg %p1968_p12 }
 0x949   : > { %v1296_v33 = vpop.xlane.xlu0 %1295 }
 0x94a   : > { %v1297_v34 = vsub.f32 %v1293_v28, %v1296_v33  ;;  %v1521_v28 = vpack.c.bf16 %v1510_v27, %v1509_v26 }
 0x94c   : > { %v1298_v35 = vmul.f32 1.442695, %v1297_v34 }
 0x94d   : > { %v1307_v36 = vpop.permute.xlu0 %1306 }
 0x94e   : > { %1930 = vpow2.f32 %v1298_v35  ;;  %v1312_v37 = vsel %vm826_vm3, %v1307_v36, 0  ;;  %v1687_v36 = vld [vmem:[%s2588_s11] ss:$0 sm:$0xff] }
 0x94f   : > { %1826 = vmatpush3.bf16.msra.mxu1 %v1312_v37 }
 0x950   : > { %1837 = vmatprep.subr.bf16.mxu1 %v2035_v10 }
 0x958   : > { %v1931_v38 = vpop.eup %1930 }
 0x959   : > { %v1300_v39 = vsel %vm763_vm2, %v1931_v38, 0.0 }
 0x95a   : > { %1301 = vadd.xlane.f32.xlu1 %v1300_v39 }
 0x986   : > { %v1236_v42 = vpop.f32.mrb[28].mxu1 }
 0x987   : > { %v1242_v43 = vadd.f32 %v1236_v42, %v2388_v59  ;;  %v1817_v44 = vpop.f32.mrb[29].mxu1  ;;  %v1514_v42 = vld [vmem:[%s2592_s15 + $0x68] sm:$0xff] }
 0x988   : > { %v1239_v45 = vpop.f32.mrb[30].mxu1  ;;  %v1515_v44 = vld [vmem:[%s2592_s15 + $0x70] sm:$0xff] }
 0x989   : > { %v1818_v46 = vpop.f32.mrb[31].mxu1  ;;  %v1516_v45 = vld [vmem:[%s2592_s15 + $0x78] sm:$0xff] }
 0x98a   : > { %v1524_v46 = vpack.c.bf16 %v1516_v45, %v1515_v44 }
 0x9e7   : > { %v1302_v48 = vpop.xlane.xlu1 %1301 }
 0x9e8   : > { %1932 = vrcp.f32 %v1302_v48  ;;  %v1689_v48 = vld [vmem:[%s2624_s23] ss:$0 sm:$0xff]  ;;  %s2627_s23 = sld [smem:[#allocation17_spill]] }
 0x9ee   : > { %s2532_s2 = scalar_lea.hbm %s2627_s23, %s1693_s21 }
 0x9f2   : > { %v1933_v49 = vpop.eup %1932 }
 0x9f3   : > { %v1304_v50 = vmul.f32 %v1933_v49, %v1931_v38  ;;  %v1688_v38 = vld [vmem:[%s2589_s12] ss:$0 sm:$0xff] }
 0x9f5   : > { %v1305_v52 = vpack.c.bf16 %v1304_v50, %v1304_v50 }
 0x9f7   : > { %1828 = vmatmul.mubr.msk.bf16.vlgmr.msra.gmra.mrb[32].mxu1 %vm763_vm2, %v1305_v52 }
 0x9f8   : > { %1841 = vmatprep.mubr.msk.bf16.mxu1 %vm2036_vm1, %v2035_v10 }
 0xaca   : > { %v1348_v53 = vpop.f32.mrb[32].mxu1 }
 0xacb   : > { %v1354_v54 = vpack.c.bf16 %v1348_v53, %v1348_v53  ;;  %v1829_v55 = vpop.f32.mrb[33].mxu1 }
 0xacc   : > { %v1351_v57 = vpop.f32.mrb[34].mxu1 }
 0xacd   : > { %v1830_v58 = vpop.f32.mrb[35].mxu1  ;;  %1834 = vmatmul.mubr.msk.bf16.vlgmr.msra.gmra.mrb[20].mxu0 %vm763_vm2, %v1354_v54  ;;  %v1691_v57 = vld [vmem:[%s2625_s18] ss:$0 sm:$0xff]  ;;  %s1972_s18 = scalar_lea.vmem %s1971_s1, 256 }
 0xace   : > { %1861 = vmatprep.mubr.msk.bf16.mxu0 %vm2036_vm1, %v2035_v10  ;;  %1846 = vmatpush3.bf16.msra.mxu0 %v1517_v18  ;;  %p1974_p10 = scmp.lt.s32.totalorder %s1972_s18, %s1966_s30 }
 0xacf   : > { %1847 = vmatprep.subr.bf16.mxu0 %v2035_v10 }
 0xad0   : > { %p1975_p2 = por %p1974_p10, %p1973_p7 }
 0xad2   : > { %1848 = vmatpush3.bf16.msra.mxu0 %v1518_v47  ;;  %p1976_p4 = pnand %p1975_p2, %p1969_p13 }
 0xad3   : > { %1849 = vmatprep.subr.bf16.mxu0 %v2035_v10 }
 0xad6   : > { %1850 = vmatpush3.bf16.msra.mxu0 %v1519_v22 }
 0xad7   : > { %1851 = vmatprep.subr.bf16.mxu0 %v2035_v10 }
 0xada   : > { %1852 = vmatpush3.bf16.msra.mxu0 %v1520_v25 }
 0xadb   : > { %1853 = vmatprep.subr.bf16.mxu0 %v2035_v10 }
 0xade   : > { %1854 = vmatpush3.bf16.msra.mxu0 %v1521_v28 }
 0xadf   : > { %1855 = vmatprep.subr.bf16.mxu0 %v2035_v10 }
 0xae2   : > { %1856 = vmatpush3.bf16.msra.mxu0 %v1522_v31 }
 0xae3   : > { %1857 = vmatprep.subr.bf16.mxu0 %v2035_v10 }
 0xba0   : > { %v1397_v59 = vpop.f32.mrb[20].mxu0 }
 0xba1   : > { %v1403_v60 = vadd.f32 %v1397_v59, %v1242_v43  ;;  %v1835_v61 = vpop.f32.mrb[21].mxu0  ;;  %v1523_v43 = vpack.c.bf16 %v1514_v42, %v1513_v56 }
 0xba2   : > { %v1400_v63 = vpop.f32.mrb[22].mxu0 }
 0xba3   : > { %v1404_v1 = vadd.f32 %v1403_v60, %v2246_v0  ;;  %v1836_v2 = vpop.f32.mrb[23].mxu0  ;;  %v1444_v0 = vld [vmem:[%s2590_s13 + $0x8] sm:$0xff]  ;;  %1858 = vmatpush3.bf16.msra.mxu0 %v1523_v43 }
 0xba4   : > { %v1447_v12 = vpack.c.bf16 %v1444_v0, %v1443_v11  ;;  %1859 = vmatprep.subr.bf16.mxu0 %v2035_v10 }
 0xba5   : > { %v2438_v3 = vadd.f32 %v1686_v62, %v1404_v1 }
 0xba6   : > { %1838 = vmatpush3.bf16.msra.mxu1 %v1447_v12 }
 0xba7   : > { %v1415_v4 = vsel %vm568_vm0, %v2438_v3, 0.0  ;;  %1839 = vmatprep.subr.bf16.mxu1 %v2035_v10  ;;  %1860 = vmatpush3.bf16.msra.mxu0 %v1524_v46 }
 0xba8   : > { %1416 = vadd.xlane.f32.xlu1 %v1415_v4 }
 0xbaa   : > { %1840 = vmatpush3.bf16.msra.mxu1 %v1448_v51 }
 0xc35   : > { %v1417_v5 = vpop.xlane.xlu1 %1416 }
 0xc36   : > { %v1418_v6 = vmul.f32 0.03125, %v1417_v5 }
 0xc38   : > { %v1419_v7 = vsub.f32 %v2438_v3, %v1418_v6 }
 0xc3a   : > { %v1420_v8 = vmul.f32 %v1419_v7, %v1419_v7 }
 0xc3c   : > { %v1421_v9 = vsel %vm568_vm0, %v1420_v8, 0.0 }
 0xc3d   : > { %1422 = vadd.xlane.f32.xlu1 %v1421_v9 }
 0xcca   : > { %v1423_v32 = vpop.xlane.xlu1 %1422 }
 0xccb   : > { %v1424_v33 = vmul.f32 0.03125, %v1423_v32 }
 0xccd   : > { %v1425_v34 = vadd.f32 1e-05, %v1424_v33 }
 0xccf   : > { %1934 = vrsqrt.f32 %v1425_v34 }
 0xcd9   : > { %v1935_v35 = vpop.eup %1934 }
 0xcda   : > { %v1427_v37 = vmul.f32 %v1935_v35, %v1419_v7 }
 0xcdc   : > { %v1434_v39 = vmul.f32 %v1687_v36, %v1427_v37 }
 0xcde   : > { %v1441_v40 = vadd.f32 %v1688_v38, %v1434_v39 }
 0xce0   : > { %v1442_v41 = vpack.c.bf16 %v1441_v40, %v1441_v40 }
 0xce2   : > { %1842 = vmatmul.mubr.msk.bf16.vlgmr.msra.gmra.mrb[36].mxu1 %vm568_vm0, %v1442_v41 }
 0xdb5   : > { %v1493_v49 = vpop.f32.mrb[36].mxu1 }
 0xdb6   : > { %v1494_v50 = vadd.f32 %v1689_v48, %v1493_v49  ;;  %v1843_v52 = vpop.f32.mrb[37].mxu1 }
 0xdb7   : > { %v1496_v10 = vpop.f32.mrb[38].mxu1 }
 0xdb8   : > { %v1499_v53 = vmax.f32 %v1494_v50, 0.0  ;;  %v1844_v54 = vpop.f32.mrb[39].mxu1 }
 0xdba   : > { %v1500_v55 = vpack.c.bf16 %v1499_v53, %v1499_v53 }
 0xdbc   : > { %1862 = vmatmul.mubr.bf16.vlgmr.msra.gmra.mrb[24].mxu0 %v1500_v55 }
 0xe8f   : > { %v1566_v58 = vpop.f32.mrb[24].mxu0 }
 0xe90   : > { %v1567_v59 = vadd.f32 %v1691_v57, %v1566_v58  ;;  %v1863_v60 = vpop.f32.mrb[25].mxu0 }
 0xe91   : > { %v1569_v61 = vpop.f32.mrb[26].mxu0 }
 0xe92   : > { %v1572_v62 = vadd.f32 %v1567_v59, %v2438_v3  ;;  %v1864_v63 = vpop.f32.mrb[27].mxu0 }
 0xe94   : > { %1573 = vst.msk [vmem:[%s563_s14] sm:$0xff] %vm568_vm0, %v1572_v62 }
 0xe95   : > { %1979 = shalt.err (!%p1976_p4)
}
 0xe96   : > { %s1980_s24 = scalar_lea.hbm %s2532_s2, 128  ;;  %s1984_s20 = scalar_lea.hbm %s2627_s23, 256 }
 0xe97   : > { %p1981_p5 = scmp.ne.s32.totalorder %s2532_s2, %s1980_s24  ;;  %p1985_p0 = scmp.lt.u32.totalorder %s2532_s2, %s2627_s23 }
 0xe98   : > { %p1986_p1 = scmp.lt.u32.totalorder %s1984_s20, %s1980_s24  ;;  %p1988_p6 = scmp.lt.u32.totalorder %s1980_s24, %s2532_s2 }
 0xe99   : > { %p1982_p8 = pnand %p1981_p5, %p2628_p11 }
 0xe9a   : > { %p1987_p3 = por %p1986_p1, %p1985_p0 }
 0xe9b   : > { %p1983_p9 = pneg %p1982_p8 }
 0xe9c   : > { %p1989_p12 = por %p1988_p6, %p1987_p3 }
 0xe9e   : > { %p1990_p13 = pnand %p1989_p12, %p1983_p9 }
 0xea0   : > { %1993 = shalt.err (!%p1990_p13)
}
 0xea1   : > { %1867 = dma.vmem_to_hbm [thread:$0]  (%p2628_p11), %s2534_s16, 128, %s2532_s2, %s1575_s28  }
 0xea2 PF: > { %s2629_s30 = sld [smem:[#allocation8_spill]]  ;;  %p2630_p7 = scmp.ne.s32.totalorder %s2616_s22, 0 }
 0xea3   : > { %p2631_p10 = scmp.ge.s32.totalorder %s2032_s27, 2 }
 0xea5   : > { %p1874_p2 = pnand %p2631_p10, %p2630_p7 }
 0xea8   : > { %s1600_s1 = sand.u32 1, %s2629_s30  }
 0xea9   : > { %s1601_s18 = scalar_lea.sflag [#allocation4], %s1600_s1 }
 0xeaa   : > { %2015 = dma.done.wait (!%p1874_p2), %s1601_s18, 128  }
 0xeab   : > { %2017 = vsyncadd (!%p1874_p2), %s1601_s18, 4294967168  ;;  %s2632_s27 = sld [smem:[#allocation9_spill]]  ;;  %s2633_s21 = sld [smem:[#allocation10_spill]] }
 0xeac   : > { %s2634_s24 = smov %s2024_s25  ;;  %s2635_s25 = smov %s2028_s26 }
 0xeb1   : > { %p30_p4 = scmp.ge.s32.totalorder %s2632_s27, 4   ;;  %s2636_s26 = smov %s2633_s21 }
 0xeb3   :  { %32 = sbr.rel (!%p30_p4) target bundleno = 12 (0xc), region = 133 }
 0xeba   :  { %1606 = vsyncpa [#allocation3], 1 }
 0xebb   :  { %1608 = vsyncpa [#allocation3 + $0x1], 1 }
 0xebc   :  { %1609 = vsyncpa [#allocation4], 1 }
 0xebd   :  { %1611 = vsyncpa [#allocation4 + $0x1], 1 }

</bundles_post_ra>
